<compile_context>
chip_gen: v6e
topology: v6e:2x2x1
jax: 0.10.0
libtpu: 0.0.40
codegen_flags: <defaults>
</compile_context>

<pallas_src>
import math

import jax
import jax.numpy as jnp
from jax.experimental import pallas as pl
from jax.experimental.pallas import tpu as pltpu

LATENT_FACTORS = 32             # HrfaConfig.latent_factors
GATE_TABLE_LEN = 6              # torch.Tensor([exp(-i) for i in range(6)])
LANES = 128                     # TPU vreg lane width
PACK = LANES // LATENT_FACTORS  # 4 batch rows per 128-lane row
MAX_BLOCK_ROWS = 4096           # packed rows per grid step (= 16384 batch rows)
SUBLANE = 32                    # blk granularity: covers f32/bf16/int8 native tiles


def _round_up(x, m):
    return (x + m - 1) // m * m


def _combine_kernel(bias_ref, gw_ref, self_ref, ref_ref, wsel_ref, expand_ref,
                    comb_ref, gate_ref):
    """
    bias_ref   : SMEM (1,)       f32       w_self bias
    gw_ref     : VMEM (blk, 4)   f32       gate_weight[clip(count,0,5)] (hoisted gather)
    self_ref   : VMEM (blk, 128) f32/bf16  packed self_latent (4 rows / 128 lanes)
    ref_ref    : VMEM (blk, 128) f32/bf16  packed ref_latent
    wsel_ref   : VMEM (128, 4)   f32       w_self weight folded into a 0/1 slot selector (resident)
    expand_ref : VMEM (4, 128)   f32       0/1 slot->lane expansion selector (resident)
    comb_ref   : VMEM (blk, 128) out       packed comb_latent (input dtype)
    gate_ref   : VMEM (blk, 4)   f32 out   packed gate
    """
    x = self_ref[...].astype(jnp.float32)                  # (blk, 128)
    r = ref_ref[...].astype(jnp.float32)                   # (blk, 128)

    # Linear(32 -> 1) for the 4 packed slots at once on the otherwise-idle MXU:
    # wsel[l, s] = w_self[l % 32] if lane l belongs to packed slot s else 0.
    w_s = jnp.dot(x, wsel_ref[...],
                  preferred_element_type=jnp.float32) + bias_ref[0]   # (blk, 4)

    gate = jax.nn.sigmoid(gw_ref[...] * w_s)               # (blk, 4)

    # Expand gate back to 128 lanes: gate_full[row, l] = gate[row, l // 32].
    gate_full = jnp.dot(gate, expand_ref[...],
                        preferred_element_type=jnp.float32)            # (blk, 128)

    comb_ref[...] = (x + gate_full * (r - x)).astype(comb_ref.dtype)
    gate_ref[...] = gate


def combine_layer(self_review_count, self_latent, ref_latent,
                  w_self_weight, w_self_bias, gate_weight,
                  block_rows=MAX_BLOCK_ROWS):
    """
    self_review_count : (B, 1) int
    self_latent       : (B, 32) float32 or bfloat16
    ref_latent        : (B, 32) float32 or bfloat16
    w_self_weight     : (1, 32) float   (torch Linear weight, out_features=1)
    w_self_bias       : (1,)    float
    gate_weight       : (6,)    float
    returns (comb_latent (B, 32) in input dtype, gate (B, 1) float32)
    """
    B, L = self_latent.shape
    assert L == LATENT_FACTORS, "kernel is specialized for latent_factors=32"
    out_dtype = self_latent.dtype

    # Hoisted gate-table lookup: masked_fill(count > 5, 5) + gate_weight[count]
    # as a tiny XLA gather (counts assumed >= 0; see NOTE at top of file).
    idx = jnp.clip(self_review_count.reshape(B).astype(jnp.int32),
                   0, GATE_TABLE_LEN - 1)
    gw = gate_weight.astype(jnp.float32)[idx]                           # (B,)

    # Pad only to the PACK=4 lane-packing granularity (at most 3 rows).
    b_pad = (-B) % PACK
    if b_pad:
        self_latent = jnp.pad(self_latent, ((0, b_pad), (0, 0)))
        ref_latent = jnp.pad(ref_latent, ((0, b_pad), (0, 0)))
        gw = jnp.pad(gw, (0, b_pad))
    Bp = B + b_pad
    rows = Bp // PACK

    # Lane-dense packing: 4 batch rows per 128-lane row (free row-major reshapes).
    self_p = self_latent.reshape(rows, LANES)
    ref_p = ref_latent.reshape(rows, LANES)
    gw_p = gw.reshape(rows, PACK)

    # Resident selector matrices (built once in the wrapper, not per block).
    lane = jnp.arange(LANES)
    slot = jnp.arange(PACK)
    slot_of_lane = lane // LATENT_FACTORS                               # (128,)
    w_rep = jnp.tile(w_self_weight.astype(jnp.float32).reshape(-1), PACK)
    wsel = jnp.where(slot_of_lane[:, None] == slot[None, :],
                     w_rep[:, None], 0.0).astype(jnp.float32)           # (128, 4)
    expand = (slot[:, None] == slot_of_lane[None, :]).astype(jnp.float32)  # (4, 128)

    # Block size: big enough to amortize per-step overhead, small enough for
    # VMEM, and capped at ~rows/2 so the grid has >= 2 steps (megacore split).
    blk = max(SUBLANE, min(_round_up(block_rows, SUBLANE),
                           _round_up(pl.cdiv(rows, 2), SUBLANE)))
    grid = (pl.cdiv(rows, blk),)   # ragged last block handled by Pallas masking

    comb_p, gate_p = pl.pallas_call(
        _combine_kernel,
        grid=grid,
        out_shape=(
            jax.ShapeDtypeStruct((rows, LANES), out_dtype),    # packed comb
            jax.ShapeDtypeStruct((rows, PACK), jnp.float32),   # packed gate
        ),
        in_specs=[
            pl.BlockSpec(memory_space=pltpu.MemorySpace.SMEM),  # bias (1,)
            pl.BlockSpec((blk, PACK), lambda i: (i, 0)),        # gw
            pl.BlockSpec((blk, LANES), lambda i: (i, 0)),       # self_latent
            pl.BlockSpec((blk, LANES), lambda i: (i, 0)),       # ref_latent
            pl.BlockSpec((LANES, PACK), lambda i: (0, 0)),      # weight selector (resident)
            pl.BlockSpec((PACK, LANES), lambda i: (0, 0)),      # gate expansion (resident)
        ],
        out_specs=(
            pl.BlockSpec((blk, LANES), lambda i: (i, 0)),       # comb
            pl.BlockSpec((blk, PACK), lambda i: (i, 0)),        # gate
        ),
        compiler_params=pltpu.CompilerParams(
            dimension_semantics=("parallel",),      # megacore on v7x, no-op on v5e/v6e
            vmem_limit_bytes=48 * 1024 * 1024,      # ~20 MiB used @ blk=4096 f32
        ),
    )(w_self_bias.astype(jnp.float32), gw_p, self_p, ref_p, wsel, expand)

    comb = comb_p.reshape(Bp, LATENT_FACTORS)[:B]
    gate = gate_p.reshape(Bp, 1)[:B]
    return comb, gate


def _reference(self_review_count, self_latent, ref_latent,
               w_self_weight, w_self_bias, gate_weight):
    # Pure-JAX reference of CombineLayer.forward (eval mode), in f32.
    x = self_latent.astype(jnp.float32)
    r = ref_latent.astype(jnp.float32)
    w = w_self_weight.astype(jnp.float32)
    b = w_self_bias.astype(jnp.float32)
    w_s = jnp.sum(x * w, axis=1, keepdims=True) + b
    idx = jnp.clip(self_review_count.astype(jnp.int32), 0, GATE_TABLE_LEN - 1)
    gw = gate_weight.astype(jnp.float32)[idx[:, 0]][:, None]
    gate = jax.nn.sigmoid(gw * w_s)
    comb = gate * r + (1.0 - gate) * x
    return comb, gate


if __name__ == "__main__":
    key = jax.random.PRNGKey(0)
    k1, k2 = jax.random.split(key, 2)

    L = LATENT_FACTORS
    bound = 1.0 / math.sqrt(L)
    w_self_weight = jax.random.uniform(k1, (1, L), jnp.float32, -bound, bound)
    w_self_bias = jax.random.uniform(k2, (1,), jnp.float32, -bound, bound)
    gate_weight = jnp.array([math.exp(-i) for i in range(GATE_TABLE_LEN)],
                            dtype=jnp.float32)

    def run_case(B, dtype, block_rows, atol, rtol):
        kk = jax.random.fold_in(key, B)
        ka, kb, kc = jax.random.split(kk, 3)
        self_review_count = jax.random.randint(ka, (B, 1), 0, 10, dtype=jnp.int32)
        self_latent = jax.random.normal(kb, (B, L), jnp.float32).astype(dtype)
        ref_latent = jax.random.normal(kc, (B, L), jnp.float32).astype(dtype)

        comb, gate = combine_layer(self_review_count, self_latent, ref_latent,
                                   w_self_weight, w_self_bias, gate_weight,
                                   block_rows=block_rows)
        comb, gate = jax.block_until_ready((comb, gate))

        comb_ref, gate_ref = _reference(self_review_count, self_latent, ref_latent,
                                        w_self_weight, w_self_bias, gate_weight)
        assert comb.shape == (B, L) and gate.shape == (B, 1)
        assert comb.dtype == dtype and gate.dtype == jnp.float32
        assert jnp.allclose(comb.astype(jnp.float32), comb_ref,
                            atol=atol, rtol=rtol), f"comb mismatch B={B} {dtype}"
        assert jnp.allclose(gate, gate_ref,
                            atol=atol, rtol=rtol), f"gate mismatch B={B} {dtype}"

    # Small f32 batch (B % 4 != 0 exercises the PACK pad + partial block).
    run_case(B=10, dtype=jnp.float32, block_rows=MAX_BLOCK_ROWS, atol=1e-4, rtol=1e-4)
    # Multi-block grid with ragged last block + megacore split logic.
    run_case(B=237, dtype=jnp.float32, block_rows=32, atol=1e-4, rtol=1e-4)
    # bf16 latent path (halved HBM traffic); looser tolerance for bf16 rounding.
    run_case(B=64, dtype=jnp.bfloat16, block_rows=MAX_BLOCK_ROWS, atol=3e-2, rtol=3e-2)

    print("KERNEL_OK")
</pallas_src>

<mosaic_0001>
module attributes {stable_mosaic.version = 11 : i64} {
  func.func @_combine_kernel(%arg0: i32, %arg1: memref<1xf32, #tpu.memory_space<smem>>, %arg2: memref<32x4xf32, #tpu.memory_space<vmem>>, %arg3: memref<32x128xf32, #tpu.memory_space<vmem>>, %arg4: memref<32x128xf32, #tpu.memory_space<vmem>>, %arg5: memref<128x4xf32, #tpu.memory_space<vmem>>, %arg6: memref<4x128xf32, #tpu.memory_space<vmem>>, %arg7: memref<32x128xf32, #tpu.memory_space<vmem>>, %arg8: memref<32x4xf32, #tpu.memory_space<vmem>>) attributes {dimension_semantics = [#tpu.dimension_semantics<parallel>], iteration_bounds = array<i64: 1>, scalar_prefetch = 0 : i64, scratch_operands = 0 : i64, tpu.core_type = #tpu.core_type<tc>, window_params = [{transform_indices = @transform_0, window_bounds = array<i64: 1>}, {transform_indices = @transform_1, window_bounds = array<i64: 32, 4>}, {transform_indices = @transform_2, window_bounds = array<i64: 32, 128>}, {transform_indices = @transform_3, window_bounds = array<i64: 32, 128>}, {pipeline_mode = #tpu.pipeline_mode<synchronous>, transform_indices = @transform_4, window_bounds = array<i64: 128, 4>}, {pipeline_mode = #tpu.pipeline_mode<synchronous>, transform_indices = @transform_5, window_bounds = array<i64: 4, 128>}, {transform_indices = @transform_6, window_bounds = array<i64: 32, 128>}, {transform_indices = @transform_7, window_bounds = array<i64: 32, 4>}]} {
    %c0 = arith.constant 0 : index
    %c0_0 = arith.constant 0 : index
    %0 = vector.load %arg3[%c0, %c0_0] : memref<32x128xf32, #tpu.memory_space<vmem>>, vector<32x128xf32>
    %c0_1 = arith.constant 0 : index
    %c0_2 = arith.constant 0 : index
    %1 = vector.load %arg4[%c0_1, %c0_2] : memref<32x128xf32, #tpu.memory_space<vmem>>, vector<32x128xf32>
    %c0_3 = arith.constant 0 : index
    %c0_4 = arith.constant 0 : index
    %2 = vector.load %arg5[%c0_3, %c0_4] : memref<128x4xf32, #tpu.memory_space<vmem>>, vector<128x4xf32>
    %cst = arith.constant dense<0.000000e+00> : vector<32x4xf32>
    %3 = tpu.matmul %0, %2, %cst {dimension_numbers = #tpu.dot_dimension_numbers<[1], [0], [0], [1], [0, 0, 1, 1], [], []>} : vector<32x128xf32>, vector<128x4xf32>, vector<32x4xf32> -> vector<32x4xf32>
    %c0_5 = arith.constant 0 : index
    %4 = memref.load %arg1[%c0_5] : memref<1xf32, #tpu.memory_space<smem>>
    %5 = vector.broadcast %4 : f32 to vector<32x4xf32>
    %6 = arith.addf %3, %5 : vector<32x4xf32>
    %c0_6 = arith.constant 0 : index
    %c0_7 = arith.constant 0 : index
    %7 = vector.load %arg2[%c0_6, %c0_7] : memref<32x4xf32, #tpu.memory_space<vmem>>, vector<32x4xf32>
    %8 = arith.mulf %7, %6 : vector<32x4xf32>
    %9 = arith.negf %8 : vector<32x4xf32>
    %10 = math.exp %9 : vector<32x4xf32>
    %cst_8 = arith.constant 1.000000e+00 : f32
    %11 = vector.broadcast %cst_8 : f32 to vector<32x4xf32>
    %12 = arith.addf %11, %10 : vector<32x4xf32>
    %13 = arith.divf %11, %12 : vector<32x4xf32>
    %c0_9 = arith.constant 0 : index
    %c0_10 = arith.constant 0 : index
    %14 = vector.load %arg6[%c0_9, %c0_10] : memref<4x128xf32, #tpu.memory_space<vmem>>, vector<4x128xf32>
    %cst_11 = arith.constant dense<0.000000e+00> : vector<32x128xf32>
    %15 = tpu.matmul %13, %14, %cst_11 {dimension_numbers = #tpu.dot_dimension_numbers<[1], [0], [0], [1], [0, 0, 1, 1], [], []>} : vector<32x4xf32>, vector<4x128xf32>, vector<32x128xf32> -> vector<32x128xf32>
    %16 = arith.subf %1, %0 : vector<32x128xf32>
    %17 = arith.mulf %15, %16 : vector<32x128xf32>
    %18 = arith.addf %0, %17 : vector<32x128xf32>
    %c0_12 = arith.constant 0 : index
    %c0_13 = arith.constant 0 : index
    %19 = vector.load %arg7[%c0_12, %c0_13] : memref<32x128xf32, #tpu.memory_space<vmem>>, vector<32x128xf32>
    tpu.vector_store %arg7[%c0_12, %c0_13], %18 {strides = array<i32>} : memref<32x128xf32, #tpu.memory_space<vmem>>, vector<32x128xf32>,
    %c0_14 = arith.constant 0 : index
    %c0_15 = arith.constant 0 : index
    %20 = vector.load %arg8[%c0_14, %c0_15] : memref<32x4xf32, #tpu.memory_space<vmem>>, vector<32x4xf32>
    tpu.vector_store %arg8[%c0_14, %c0_15], %13 {strides = array<i32>} : memref<32x4xf32, #tpu.memory_space<vmem>>, vector<32x4xf32>,
    return
  }
  func.func @transform_0(%arg0: i32) -> i32 {
    %c0_i32 = arith.constant 0 : i32
    %c0_i32_0 = arith.constant 0 : i32
    return %c0_i32 : i32
  }
  func.func @transform_1(%arg0: i32) -> (i32, i32) {
    %c0_i32 = arith.constant 0 : i32
    %c0_i32_0 = arith.constant 0 : i32
    return %arg0, %c0_i32 : i32, i32
  }
  func.func @transform_2(%arg0: i32) -> (i32, i32) {
    %c0_i32 = arith.constant 0 : i32
    %c0_i32_0 = arith.constant 0 : i32
    return %arg0, %c0_i32 : i32, i32
  }
  func.func @transform_3(%arg0: i32) -> (i32, i32) {
    %c0_i32 = arith.constant 0 : i32
    %c0_i32_0 = arith.constant 0 : i32
    return %arg0, %c0_i32 : i32, i32
  }
  func.func @transform_4(%arg0: i32) -> (i32, i32) {
    %c0_i32 = arith.constant 0 : i32
    %c0_i32_0 = arith.constant 0 : i32
    %c0_i32_1 = arith.constant 0 : i32
    return %c0_i32, %c0_i32_0 : i32, i32
  }
  func.func @transform_5(%arg0: i32) -> (i32, i32) {
    %c0_i32 = arith.constant 0 : i32
    %c0_i32_0 = arith.constant 0 : i32
    %c0_i32_1 = arith.constant 0 : i32
    return %c0_i32, %c0_i32_0 : i32, i32
  }
  func.func @transform_6(%arg0: i32) -> (i32, i32) {
    %c0_i32 = arith.constant 0 : i32
    %c0_i32_0 = arith.constant 0 : i32
    return %arg0, %c0_i32 : i32, i32
  }
  func.func @transform_7(%arg0: i32) -> (i32, i32) {
    %c0_i32 = arith.constant 0 : i32
    %c0_i32_0 = arith.constant 0 : i32
    return %arg0, %c0_i32 : i32, i32
  }
}

</mosaic_0001>

<bundles_post_ra>
// kernel: tpu_custom_call.1
= control target key start
LH: loop header
LB: loop body
LE: loop exit
PB: predicated region body
PF: predicated region fallthrough
CT: control target
= control target key end

     0   :  { %14 = vsyncpa [#allocation4], 0  ;;  %s630_s0 = inlined_call_operand.<no memory space> [shape: f32[1], index: 0, kind: input, shape index: {}]   ;;  %s631_s1 = inlined_call_operand.vmem [shape: f32[3,4], index: 1, kind: input, shape index: {}]   ;;  %s632_s2 = inlined_call_operand.vmem [shape: f32[3,128], index: 2, kind: input, shape index: {}]   ;;  %s633_s3 = inlined_call_operand.vmem [shape: f32[3,128], index: 3, kind: input, shape index: {}]   ;;  %s634_s4 = inlined_call_operand.vmem [shape: f32[128,4], index: 4, kind: input, shape index: {}]   ;;  %s635_s5 = inlined_call_operand.vmem [shape: f32[4,128], index: 5, kind: input, shape index: {}]   ;;  %s636_s6 = inlined_call_operand.hbm [shape: f32[3,128], index: 6, kind: output, shape index: {0}]   ;;  %s637_s7 = inlined_call_operand.hbm [shape: f32[3,4], index: 7, kind: output, shape index: {1}]  }
   0x1   :  { %15 = vsyncpa [#allocation6], 0  ;;  %v51_v0 = vld [vmem:[%s634_s4 + $0x78] sm:$0xff]  ;;  %v50_v1 = vld [vmem:[%s634_s4 + $0x70] sm:$0xff]  ;;  %vm185_vm0 = vcmask 1043456   ;;  %v53_v21 = vstv %s630_s0  ;;  %vm172_vm1 = vcmask 31744  }
   0x2   :  { %360 = vmatprep.subr.mxu0 %v51_v0  ;;  %v49_v2 = vld [vmem:[%s634_s4 + $0x68] sm:$0xff]  ;;  %v48_v3 = vld [vmem:[%s634_s4 + $0x60] sm:$0xff]  ;;  %v47_v5 = vld [vmem:[%s634_s4 + $0x58] sm:$0xff] }
   0x3   :  { %361 = vmatpush3.msra.mxu0 %v51_v0  ;;  %v529_v4 = vld [vmem:[%s632_s2] sm:$0xff]  ;;  %v46_v6 = vld [vmem:[%s634_s4 + $0x50] sm:$0xff]  ;;  %v45_v7 = vld [vmem:[%s634_s4 + $0x48] sm:$0xff] }
   0x4   :  { %362 = vmatprep.subr.mxu0 %v50_v1  ;;  %392 = vmatprep.mubr.f32.mxu0 %v529_v4  ;;  %v44_v8 = vld [vmem:[%s634_s4 + $0x40] sm:$0xff]  ;;  %v43_v9 = vld [vmem:[%s634_s4 + $0x38] sm:$0xff]  ;;  %v42_v10 = vld [vmem:[%s634_s4 + $0x30] sm:$0xff] }
   0x5   :  { %363 = vmatpush3.msra.mxu0 %v50_v1  ;;  %v41_v11 = vld [vmem:[%s634_s4 + $0x28] sm:$0xff]  ;;  %v40_v12 = vld [vmem:[%s634_s4 + $0x20] sm:$0xff]  ;;  %v39_v13 = vld [vmem:[%s634_s4 + $0x18] sm:$0xff] }
   0x6   :  { %364 = vmatprep.subr.mxu0 %v49_v2  ;;  %v38_v14 = vld [vmem:[%s634_s4 + $0x10] sm:$0xff]  ;;  %v37_v15 = vld [vmem:[%s634_s4 + $0x8] sm:$0xff]  ;;  %v36_v16 = vld [vmem:[%s634_s4] sm:$0xff] }
   0x7   :  { %365 = vmatpush3.msra.mxu0 %v49_v2  ;;  %v571_v17 = vld [vmem:[%s632_s2 + $0x8] sm:$0xff]  ;;  %v576_v18 = vld [vmem:[%s632_s2 + $0x10] sm:$0xff]  ;;  %v583_v19 = vld [vmem:[%s632_s2 + $0x18] sm:$0xff] }
   0x8   :  { %366 = vmatprep.subr.mxu0 %v48_v3  ;;  %v171_v20 = vld [vmem:[%s635_s5] sm:$0xf]  ;;  %v140_v23 = vld [vmem:[%s631_s1 + $0x8] sm:$0xff]  ;;  %v142_v30 = vld [vmem:[%s631_s1 + $0x18] sm:$0xff] }
   0x9   :  { %367 = vmatpush3.msra.mxu0 %v48_v3  ;;  %398 = vmatprep.subr.msk.mxu1 %vm185_vm0, %v171_v20  ;;  %v139_v26 = vld [vmem:[%s631_s1] sm:$0xff]  ;;  %v141_v35 = vld [vmem:[%s631_s1 + $0x10] sm:$0xff]  ;;  %v33_v54 = vld [vmem:[%s633_s3 + $0x8] sm:$0xff] }
   0xa   :  { %368 = vmatprep.subr.mxu0 %v47_v5  ;;  %399 = vmatpush3.msk.msra.mxu1 %vm185_vm0, %v171_v20  ;;  %v32_v55 = vld [vmem:[%s633_s3] sm:$0xff]  ;;  %v275_v56 = vsub.f32 %v33_v54, %v571_v17  ;;  %v35_v57 = vld [vmem:[%s633_s3 + $0x18] sm:$0xff]  ;;  %v34_v60 = vld [vmem:[%s633_s3 + $0x10] sm:$0xff] }
   0xb   :  { %369 = vmatpush3.msra.mxu0 %v47_v5  ;;  %v274_v58 = vsub.f32 %v32_v55, %v529_v4  ;;  %v277_v62 = vsub.f32 %v35_v57, %v583_v19  ;;  %v276_v2 = vsub.f32 %v34_v60, %v576_v18 }
   0xc   :  { %370 = vmatprep.subr.mxu0 %v46_v6 }
   0xd   :  { %371 = vmatpush3.msra.mxu0 %v46_v6 }
   0xe   :  { %372 = vmatprep.subr.mxu0 %v45_v7 }
   0xf   :  { %373 = vmatpush3.msra.mxu0 %v45_v7 }
  0x10   :  { %374 = vmatprep.subr.mxu0 %v44_v8 }
  0x11   :  { %375 = vmatpush3.msra.mxu0 %v44_v8 }
  0x12   :  { %376 = vmatprep.subr.mxu0 %v43_v9 }
  0x13   :  { %377 = vmatpush3.msra.mxu0 %v43_v9 }
  0x14   :  { %378 = vmatprep.subr.mxu0 %v42_v10 }
  0x15   :  { %379 = vmatpush3.msra.mxu0 %v42_v10 }
  0x16   :  { %380 = vmatprep.subr.mxu0 %v41_v11 }
  0x17   :  { %381 = vmatpush3.msra.mxu0 %v41_v11 }
  0x18   :  { %382 = vmatprep.subr.mxu0 %v40_v12 }
  0x19   :  { %383 = vmatpush3.msra.mxu0 %v40_v12 }
  0x1a   :  { %384 = vmatprep.subr.mxu0 %v39_v13 }
  0x1b   :  { %385 = vmatpush3.msra.mxu0 %v39_v13 }
  0x1c   :  { %386 = vmatprep.subr.mxu0 %v38_v14 }
  0x1d   :  { %387 = vmatpush3.msra.mxu0 %v38_v14 }
  0x1e   :  { %388 = vmatprep.subr.mxu0 %v37_v15 }
  0x1f   :  { %389 = vmatpush3.msra.mxu0 %v37_v15 }
  0x20   :  { %390 = vmatprep.subr.mxu0 %v36_v16 }
  0x21   :  { %391 = vmatpush3.msra.mxu0 %v36_v16 }
  0x22   :  { %393 = vmatmul.mubr.f32.vlgmr.msra.gmra.mxu0 %v571_v17 }
  0x23   :  { %395 = vmatprep.mubr.f32.mxu0 %v576_v18 }
  0x26   :  { %396 = vmatmul.mubr.f32.gmra.mxu0 %v583_v19 }
  0xe2   :  { %v394_v22 = vpop.f32.mrf.mxu0 }
  0xe3   :  { %v126_v24 = vadd.f32 %v394_v22, %v53_v21 }
  0xe4   :  { %v120_v25 = vpop.f32.mrf.mxu0 }
  0xe5   :  { %v144_v27 = vmul.f32 %v140_v23, %v126_v24  ;;  %v121_v28 = vadd.f32 %v120_v25, %v53_v21 }
  0xe6   :  { %v397_v29 = vpop.f32.mrf.mxu0 }
  0xe7   :  { %v327_v31 = vmul.f32 -1.442695, %v144_v27  ;;  %v143_v32 = vmul.f32 %v139_v26, %v121_v28  ;;  %v136_v33 = vadd.f32 %v397_v29, %v53_v21 }
  0xe8   :  { %v130_v34 = vpop.f32.mrf.mxu0 }
  0xe9   :  { %410 = vpow2.f32 %v327_v31  ;;  %v326_v36 = vmul.f32 -1.442695, %v143_v32  ;;  %v146_v37 = vmul.f32 %v142_v30, %v136_v33  ;;  %v131_v38 = vadd.f32 %v130_v34, %v53_v21 }
  0xeb   :  { %412 = vpow2.f32 %v326_v36  ;;  %v329_v39 = vmul.f32 -1.442695, %v146_v37  ;;  %v145_v40 = vmul.f32 %v141_v35, %v131_v38 }
  0xed   :  { %414 = vpow2.f32 %v329_v39  ;;  %v328_v41 = vmul.f32 -1.442695, %v145_v40 }
  0xef   :  { %416 = vpow2.f32 %v328_v41 }
  0xf6   :  { %v411_v42 = vpop.eup %410 }
  0xf7   :  { %v160_v43 = vadd.f32 1.0, %v411_v42 }
  0xf8   :  { %v413_v44 = vpop.eup %412 }
  0xf9   :  { %418 = vrcp.f32 %v160_v43  ;;  %v159_v45 = vadd.f32 1.0, %v413_v44 }
  0xfa   :  { %v415_v46 = vpop.eup %414 }
  0xfb   :  { %420 = vrcp.f32 %v159_v45  ;;  %v162_v47 = vadd.f32 1.0, %v415_v46 }
  0xfc   :  { %v417_v48 = vpop.eup %416 }
  0xfd   :  { %422 = vrcp.f32 %v162_v47  ;;  %v161_v49 = vadd.f32 1.0, %v417_v48 }
  0xff   :  { %424 = vrcp.f32 %v161_v49 }
 0x106   :  { %v419_v50 = vpop.eup %418 }
 0x107   :  { %291 = vst.msk [vmem:[#allocation5 + $0x8] sm:$0xff] %vm172_vm1, %v419_v50 }
 0x108   :  { %v421_v51 = vpop.eup %420 }
 0x109   :  { %400 = vmatprep.mubr.msk.f32.mxu1 %vm172_vm1, %v421_v51  ;;  %290 = vst.msk [vmem:[#allocation5] sm:$0xff] %vm172_vm1, %v421_v51 }
 0x10a   :  { %v423_v52 = vpop.eup %422  ;;  %401 = vmatmul.mubr.msk.f32.vlgmr.msra.gmra.mxu1 %vm172_vm1, %v419_v50 }
 0x10b   :  { %293 = vst.msk [vmem:[#allocation5 + $0x18] sm:$0xff] %vm172_vm1, %v423_v52 }
 0x10c   :  { %v425_v53 = vpop.eup %424 }
 0x10d   :  { %292 = vst.msk [vmem:[#allocation5 + $0x10] sm:$0xff] %vm172_vm1, %v425_v53  ;;  %403 = vmatprep.mubr.msk.f32.mxu1 %vm172_vm1, %v425_v53 }
 0x10e   :  { %404 = vmatmul.mubr.msk.f32.gmra.mxu1 %vm172_vm1, %v423_v52 }
 0x1ca   :  { %v402_v59 = vpop.f32.mrf.mxu1 }
 0x1cb   :  { %v279_v61 = vmul.f32 %v402_v59, %v275_v56 }
 0x1cc   :  { %v255_v63 = vpop.f32.mrf.mxu1 }
 0x1cd   :  { %v283_v0 = vadd.f32 %v279_v61, %v571_v17  ;;  %v278_v1 = vmul.f32 %v274_v58, %v255_v63 }
 0x1ce   :  { %v405_v3 = vpop.f32.mrf.mxu1 }
 0x1cf   :  { %287 = vst [vmem:[#allocation3 + $0x8] sm:$0xff] %v283_v0  ;;  %v282_v5 = vadd.f32 %v278_v1, %v529_v4  ;;  %v281_v6 = vmul.f32 %v405_v3, %v277_v62 }
 0x1d0   :  { %v265_v7 = vpop.f32.mrf.mxu1 }
 0x1d1   :  { %286 = vst [vmem:[#allocation3] sm:$0xff] %v282_v5  ;;  %v285_v8 = vadd.f32 %v281_v6, %v583_v19  ;;  %v280_v9 = vmul.f32 %v276_v2, %v265_v7 }
 0x1d3   :  { %289 = vst [vmem:[#allocation3 + $0x18] sm:$0xff] %v285_v8  ;;  %v284_v10 = vadd.f32 %v280_v9, %v576_v18 }
 0x1d5   :  { %288 = vst [vmem:[#allocation3 + $0x10] sm:$0xff] %v284_v10 }
 0x1d6   :  { %298 = vsyncadd [#allocation4], 448  ;;  %s470_s3 = smov [#allocation3]  }
 0x1d7   :  { %s299_s10 = sshll.u32 %s470_s3, 4  ;;  %s300_s10 = int_to_ptr.vmem [resolvable:$true] %s299_s10 }
 0x1d8   :  { %s426_s11 = scalar_lea.vmem %s300_s10, 64  ;;  %s430_s12 = scalar_lea.vmem %s300_s10, 512 }
 0x1d9   :  { %p427_p0 = scmp.ne.s32.totalorder %s300_s10, %s426_s11  ;;  %p431_p1 = scmp.lt.s32.totalorder %s300_s10, %s300_s10 }
 0x1da   :  { %p432_p2 = scmp.lt.s32.totalorder %s430_s12, %s426_s11 }
 0x1dc   :  { %p433_p3 = por %p432_p2, %p431_p1 }
 0x1de   :  { %p434_p4 = pnand %p433_p3, %p427_p0 }
 0x1e0   :  { %437 = shalt.err (!%p434_p4)
}
 0x1e1   :  { %s471_s13 = smov 64   ;;  %s472_s14 = smov 4  }
 0x1e2   :  { %305 = dma.vmem_to_hbm [thread:$0]  %s300_s10, 64, %s636_s6, [#allocation4], %s471_s13, %s471_s13, %s472_s14  }
 0x1e3   :  { %310 = vsyncadd [#allocation6], 448  ;;  %s473_s4 = smov [#allocation5]  }
 0x1e4   :  { %s311_s17 = sshll.u32 %s473_s4, 4  ;;  %s312_s17 = int_to_ptr.vmem [resolvable:$true] %s311_s17 }
 0x1e5   :  { %s446_s18 = scalar_lea.vmem %s312_s17, 64  ;;  %s450_s19 = scalar_lea.vmem %s312_s17, 512 }
 0x1e6   :  { %p447_p5 = scmp.ne.s32.totalorder %s312_s17, %s446_s18  ;;  %p451_p6 = scmp.lt.s32.totalorder %s312_s17, %s312_s17 }
 0x1e7   :  { %p452_p7 = scmp.lt.s32.totalorder %s450_s19, %s446_s18 }
 0x1e9   :  { %p453_p8 = por %p452_p7, %p451_p6 }
 0x1eb   :  { %p454_p9 = pnand %p453_p8, %p447_p5 }
 0x1ed   :  { %457 = shalt.err (!%p454_p9)
}
 0x1ee   :  { %317 = dma.vmem_to_hbm [thread:$0]  %s312_s17, 64, %s637_s7, [#allocation6], %s471_s13, %s471_s13, %s472_s14  }
 0x1ef   :  { %466 = dma.done.wait [#allocation4], 512  }
 0x1f0   :  { %467 = vsyncadd [#allocation4], 4294966784 }
 0x1f1   :  { %468 = dma.done.wait [#allocation6], 512  }
 0x1f2   :  { %469 = vsyncadd [#allocation6], 4294966784 }
 0x1f3   :  { %324 = vsyncpa [#allocation4], 1 }
 0x1f4   :  { %325 = vsyncpa [#allocation6], 1 }

</bundles_post_ra>
